<compile_context>
chip_gen: v5e
topology: v5e:2x2
jax: 0.10.0
libtpu: 0.0.40
codegen_flags: <defaults>
</compile_context>

<pallas_src>
import functools

import jax
import jax.numpy as jnp
from jax.experimental import pallas as pl
from jax.experimental.pallas import tpu as pltpu

_LANE = 128   # vreg lane count
_SUB = 8      # f32 sublane count


def _accuracy_kernel(yp_ref, yt_ref, out_ref, acc_ref, *, n_valid):
    i = pl.program_id(0)

    @pl.when(i == 0)
    def _init():
        acc_ref[...] = jnp.zeros_like(acc_ref)

    yp = yp_ref[...]                      # (TILE_R, 128) f32
    yt = yt_ref[...]                      # (TILE_R, 128) f32
    # Keep the divide (rather than abs(diff) > 0.05*yt) so behaviour for
    # non-positive / zero y_true matches the PyTorch reference exactly; the
    # kernel is HBM-bandwidth-bound so the divide cost is hidden by DMA.
    err = jnp.abs(yp - yt) / yt
    # Direct bool->f32 cast replaces the ones_like/zeros_like jnp.where.
    # Padding elements have err == 0 -> contribute 0 to the count.
    inaccurate = (err > 0.05).astype(jnp.float32)
    acc_ref[...] += jnp.sum(inaccurate, keepdims=True)

    @pl.when(i == pl.num_programs(0) - 1)
    def _finalize():
        out_ref[...] = 1.0 - acc_ref[...] / n_valid


def temperature_accuracy_5(y_pred, y_true, *, max_tile_rows=1024):
    """Pallas equivalent of TemperatureAccuracy5.forward. Returns scalar f32."""
    n = y_pred.shape[0]

    # ---- pick a lane-dense (rows, 128) layout and a row tile ----
    rows = -(-n // _LANE)                      # cdiv
    rows = -(-rows // _SUB) * _SUB             # multiple of 8 sublanes
    tile_r = min(max_tile_rows, rows)
    tile_r = max(_SUB, (tile_r // _SUB) * _SUB)
    rows = -(-rows // tile_r) * tile_r         # full blocks only
    padded = rows * _LANE
    # Per-input block = tile_r*128*4 B (<= 512 KiB by default); 2 inputs x 2
    # pipeline buffers stays far under the 16 MiB (v5e) / 32 MiB (v6e/v7x)
    # default scoped-VMEM limits — no vmem_limit_bytes override needed.

    # Pad BOTH arrays with 1.0 -> diff==0 -> "accurate" -> contributes 0 to
    # the inaccurate count; the mean divides by the true n, not padded size.
    yp = jnp.pad(y_pred.astype(jnp.float32), (0, padded - n),
                 constant_values=1.0).reshape(rows, _LANE)
    yt = jnp.pad(y_true.astype(jnp.float32), (0, padded - n),
                 constant_values=1.0).reshape(rows, _LANE)

    grid = (rows // tile_r,)
    kernel = functools.partial(_accuracy_kernel, n_valid=n)

    out = pl.pallas_call(
        kernel,
        out_shape=jax.ShapeDtypeStruct((1, 1), jnp.float32),
        grid_spec=pltpu.PrefetchScalarGridSpec(
            num_scalar_prefetch=0,
            grid=grid,
            in_specs=[
                pl.BlockSpec((tile_r, _LANE), lambda i: (i, 0)),
                pl.BlockSpec((tile_r, _LANE), lambda i: (i, 0)),
            ],
            out_specs=pl.BlockSpec((1, 1), lambda i: (0, 0)),
            scratch_shapes=[pltpu.VMEM((1, 1), jnp.float32)],
        ),
        compiler_params=pltpu.CompilerParams(
            dimension_semantics=("arbitrary",),   # reduction over row blocks
        ),
    )(yp, yt)
    # NOTE: on v7x (2 TCs), a leading size-2 "parallel" grid axis producing two
    # partial counts (combined outside) would shard the streaming over both
    # cores for very large N; omitted here to keep the single-scalar output.
    return out[0, 0]


def _reference(y_pred, y_true):
    err = jnp.abs(y_pred - y_true) / y_true
    return 1.0 - jnp.mean(jnp.where(err > 0.05, 1.0, 0.0).astype(jnp.float32))


if __name__ == "__main__":
    key = jax.random.PRNGKey(0)

    # ---- small batch (matches the module's [batch_size] contract) ----
    k1, k2 = jax.random.split(key)
    batch = 8
    y_true = 280.0 + 40.0 * jax.random.uniform(k1, (batch,), dtype=jnp.float32)
    noise = 30.0 * (jax.random.uniform(k2, (batch,), dtype=jnp.float32) - 0.5)
    y_pred = y_true + noise

    acc = jax.block_until_ready(temperature_accuracy_5(y_pred, y_true))
    ref = _reference(y_pred, y_true)
    assert jnp.allclose(acc, ref, atol=1e-6), (acc, ref)

    # ---- larger batch exercising the multi-block streaming reduction ----
    k3, k4 = jax.random.split(k2)
    batch2 = 5000
    y_true2 = 250.0 + 100.0 * jax.random.uniform(k3, (batch2,), dtype=jnp.float32)
    noise2 = 40.0 * (jax.random.uniform(k4, (batch2,), dtype=jnp.float32) - 0.5)
    y_pred2 = y_true2 + noise2

    acc2 = jax.block_until_ready(
        temperature_accuracy_5(y_pred2, y_true2, max_tile_rows=8))  # grid=(5,)
    ref2 = _reference(y_pred2, y_true2)
    assert jnp.allclose(acc2, ref2, atol=1e-6), (acc2, ref2)

    print("KERNEL_OK")
</pallas_src>

<mosaic_0001>
module attributes {stable_mosaic.version = 11 : i64} {
  func.func @_accuracy_kernel(%arg0: i32, %arg1: memref<8x128xf32, #tpu.memory_space<vmem>>, %arg2: memref<8x128xf32, #tpu.memory_space<vmem>>, %arg3: memref<1x1xf32, #tpu.memory_space<vmem>>, %arg4: memref<1x1xf32, #tpu.memory_space<vmem>>) attributes {dimension_semantics = [#tpu.dimension_semantics<arbitrary>], iteration_bounds = array<i64: 1>, scalar_prefetch = 0 : i64, scratch_operands = 1 : i64, tpu.core_type = #tpu.core_type<tc>, window_params = [{transform_indices = @transform_0, window_bounds = array<i64: 8, 128>}, {transform_indices = @transform_1, window_bounds = array<i64: 8, 128>}, {pipeline_mode = #tpu.pipeline_mode<synchronous>, transform_indices = @transform_2, window_bounds = array<i64: 1, 1>}]} {
    %c0_i32 = arith.constant 0 : i32
    %0 = arith.cmpi eq, %arg0, %c0_i32 : i32
    %1 = arith.extui %0 : i1 to i32
    %c0_i32_0 = arith.constant 0 : i32
    %2 = arith.cmpi ne, %1, %c0_i32_0 : i32
    scf.if %2 {
      %cst_11 = arith.constant 0.000000e+00 : f32
      %23 = vector.broadcast %cst_11 : f32 to vector<1x1xf32>
      %c0_12 = arith.constant 0 : index
      %c0_13 = arith.constant 0 : index
      %24 = vector.load %arg4[%c0_12, %c0_13] : memref<1x1xf32, #tpu.memory_space<vmem>>, vector<1x1xf32>
      tpu.vector_store %arg4[%c0_12, %c0_13], %23 {strides = array<i32>} : memref<1x1xf32, #tpu.memory_space<vmem>>, vector<1x1xf32>,
    } else {
    }
    %c0 = arith.constant 0 : index
    %c0_1 = arith.constant 0 : index
    %3 = vector.load %arg1[%c0, %c0_1] : memref<8x128xf32, #tpu.memory_space<vmem>>, vector<8x128xf32>
    %c0_2 = arith.constant 0 : index
    %c0_3 = arith.constant 0 : index
    %4 = vector.load %arg2[%c0_2, %c0_3] : memref<8x128xf32, #tpu.memory_space<vmem>>, vector<8x128xf32>
    %5 = arith.subf %3, %4 : vector<8x128xf32>
    %6 = math.absf %5 : vector<8x128xf32>
    %7 = arith.divf %6, %4 : vector<8x128xf32>
    %cst = arith.constant 5.000000e-02 : f32
    %8 = vector.broadcast %cst : f32 to vector<8x128xf32>
    %9 = arith.cmpf ogt, %7, %8 : vector<8x128xf32>
    %10 = arith.extui %9 : vector<8x128xi1> to vector<8x128xi32>
    %11 = arith.sitofp %10 : vector<8x128xi32> to vector<8x128xf32>
    %c0_4 = arith.constant 0 : index
    %c0_5 = arith.constant 0 : index
    %12 = vector.load %arg4[%c0_4, %c0_5] : memref<1x1xf32, #tpu.memory_space<vmem>>, vector<1x1xf32>
    %13 = vector.shape_cast %11 : vector<8x128xf32> to vector<1x8x128xf32>
    %cst_6 = arith.constant dense<0.000000e+00> : vector<1xf32>
    %14 = vector.multi_reduction <add>, %13, %cst_6 [1, 2] : vector<1x8x128xf32> to vector<1xf32>
    %15 = vector.shape_cast %14 : vector<1xf32> to vector<1x1x1xf32>
    %16 = vector.extract %15[0, 0, 0] : f32 from vector<1x1x1xf32>
    %17 = vector.broadcast %16 : f32 to vector<1x1xf32>
    %18 = arith.addf %12, %17 : vector<1x1xf32>
    %c0_7 = arith.constant 0 : index
    %c0_8 = arith.constant 0 : index
    %19 = vector.load %arg4[%c0_7, %c0_8] : memref<1x1xf32, #tpu.memory_space<vmem>>, vector<1x1xf32>
    tpu.vector_store %arg4[%c0_7, %c0_8], %18 {strides = array<i32>} : memref<1x1xf32, #tpu.memory_space<vmem>>, vector<1x1xf32>,
    %c0_i32_9 = arith.constant 0 : i32
    %20 = arith.cmpi eq, %arg0, %c0_i32_9 : i32
    %21 = arith.extui %20 : i1 to i32
    %c0_i32_10 = arith.constant 0 : i32
    %22 = arith.cmpi ne, %21, %c0_i32_10 : i32
    scf.if %22 {
      %c0_11 = arith.constant 0 : index
      %c0_12 = arith.constant 0 : index
      %23 = vector.load %arg4[%c0_11, %c0_12] : memref<1x1xf32, #tpu.memory_space<vmem>>, vector<1x1xf32>
      %cst_13 = arith.constant 8.000000e+00 : f32
      %24 = vector.broadcast %cst_13 : f32 to vector<1x1xf32>
      %25 = arith.divf %23, %24 : vector<1x1xf32>
      %cst_14 = arith.constant 1.000000e+00 : f32
      %26 = vector.broadcast %cst_14 : f32 to vector<1x1xf32>
      %27 = arith.subf %26, %25 : vector<1x1xf32>
      %c0_15 = arith.constant 0 : index
      %c0_16 = arith.constant 0 : index
      %28 = vector.load %arg3[%c0_15, %c0_16] : memref<1x1xf32, #tpu.memory_space<vmem>>, vector<1x1xf32>
      tpu.vector_store %arg3[%c0_15, %c0_16], %27 {strides = array<i32>} : memref<1x1xf32, #tpu.memory_space<vmem>>, vector<1x1xf32>,
    } else {
    }
    return
  }
  func.func @transform_0(%arg0: i32) -> (i32, i32) {
    %c0_i32 = arith.constant 0 : i32
    %c0_i32_0 = arith.constant 0 : i32
    return %arg0, %c0_i32 : i32, i32
  }
  func.func @transform_1(%arg0: i32) -> (i32, i32) {
    %c0_i32 = arith.constant 0 : i32
    %c0_i32_0 = arith.constant 0 : i32
    return %arg0, %c0_i32 : i32, i32
  }
  func.func @transform_2(%arg0: i32) -> (i32, i32) {
    %c0_i32 = arith.constant 0 : i32
    %c0_i32_0 = arith.constant 0 : i32
    %c0_i32_1 = arith.constant 0 : i32
    return %c0_i32, %c0_i32_0 : i32, i32
  }
}

</mosaic_0001>

<bundles_post_ra>
// kernel: tpu_custom_call.1
= control target key start
LH: loop header
LB: loop body
LE: loop exit
PB: predicated region body
PF: predicated region fallthrough
CT: control target
= control target key end

     0   :  { %7 = vsyncpa [#allocation4], 0  ;;  %s236_s0 = inlined_call_operand.hbm [shape: f32[8,128], index: 0, kind: input, shape index: {}]   ;;  %s237_s1 = inlined_call_operand.hbm [shape: f32[8,128], index: 1, kind: input, shape index: {}]   ;;  %s238_s2 = inlined_call_operand.hbm [shape: f32[1,1], index: 2, kind: output, shape index: {}]  }
   0x1   :  { %8 = vsyncpa [#allocation7], 0 }
   0x2   :  { %9 = vsyncpa [#allocation5], 0  ;;  %s15_s11 = sshll.u32 %s236_s0, 4  ;;  %s204_s12 = smov [#allocation3]   ;;  %s16_s11 = int_to_ptr.hbm [resolvable:$true] %s15_s11 }
   0x3   :  { %s17_s13 = sshll.u32 %s204_s12, 4  ;;  %s26_s16 = sshll.u32 %s237_s1, 4  ;;  %s18_s13 = int_to_ptr.vmem [resolvable:$true] %s17_s13  ;;  %s27_s16 = int_to_ptr.hbm [resolvable:$true] %s26_s16 }
   0x4   :  { %20 = dma.hbm_to_vmem [thread:$0]  %s16_s11, 128, %s18_s13, [#allocation4]  }
   0x5   :  { %s205_s17 = smov [#allocation6]  }
   0x6   :  { %s28_s18 = sshll.u32 %s205_s17, 4  ;;  %s29_s18 = int_to_ptr.vmem [resolvable:$true] %s28_s18 }
   0x7   :  { %31 = dma.hbm_to_vmem [thread:$0]  %s27_s16, 128, %s29_s18, [#allocation7]  }
   0x8   :  { %198 = dma.done.wait [#allocation4], 128  }
   0x9   :  { %199 = vsyncadd [#allocation4], 4294967168 }
   0xa   :  { %200 = dma.done.wait [#allocation7], 128  }
   0xb   :  { %201 = vsyncadd [#allocation7], 4294967168  ;;  %vm44_vm0 = vcmask 0   ;;  %v206_v0 = vmov 0.0   ;;  %v47_v1 = vld [vmem:[#allocation6] sm:$0xff]  ;;  %v46_v2 = vld [vmem:[#allocation3] sm:$0xff] }
   0xc   :  { %45 = vst.msk [vmem:[#allocation2] sm:$0x1] %vm44_vm0, %v206_v0  ;;  %122 = vrcp.f32 %v47_v1  ;;  %v48_v5 = vsub.f32 %v46_v2, %v47_v1  ;;  %v61_v6 = vand.u32 2147483648, %v47_v1  ;;  %vm55_vm1 = vweird.f32 %v47_v1  ;;  %s208_s1 = smov [#allocation8]   ;;  %s103_s22 = sshll.u32 %s238_s2, 4  ;;  %s104_s22 = int_to_ptr.hbm [resolvable:$true] %s103_s22 }
   0xd   :  { %v59_v8 = vand.u32 2147483647, %v47_v1  ;;  %v207_v24 = vmov 8.0   ;;  %s101_s19 = sshll.u32 %s208_s1, 4  ;;  %s102_s19 = int_to_ptr.vmem [resolvable:$true] %s101_s19 }
   0xe   :  { %v62_v10 = vor.u32 1.1754944e-38, %v61_v6  ;;  %v49_v11 = vand.u32 2147483647, %v48_v5  ;;  %124 = vrcp.f32 %v207_v24 }
   0xf   :  { %vm60_vm4 = vcmp.eq.f32.partialorder %v59_v8, 8.507059e+37 }
  0x12   :  { %v123_v3 = vpop.eup %122 }
  0x13   :  { %v51_v4 = vmul.f32 %v123_v3, %v47_v1  ;;  %vm56_vm2 = vweird.f32 %v123_v3  ;;  %v68_v28 = vld [vmem:[#allocation2] sm:$0x1] }
  0x14   :  { %vm57_vm3 = vmor %vm55_vm1, %vm56_vm2  ;;  %v125_v25 = vpop.eup %124 }
  0x15   :  { %v52_v7 = vsub.f32 1.0, %v51_v4  ;;  %v87_v26 = vmul.f32 8.0, %v125_v25  ;;  %vm91_vm6 = vweird.f32 %v125_v25 }
  0x17   :  { %v53_v9 = vmul.f32 %v123_v3, %v52_v7  ;;  %v88_v27 = vsub.f32 1.0, %v87_v26 }
  0x19   :  { %v54_v12 = vadd.f32 %v123_v3, %v53_v9  ;;  %v89_v30 = vmul.f32 %v125_v25, %v88_v27 }
  0x1b   :  { %v58_v13 = vsel %vm57_vm3, %v123_v3, %v54_v12  ;;  %v90_v32 = vadd.f32 %v125_v25, %v89_v30 }
  0x1c   :  { %v63_v14 = vsel %vm60_vm4, %v62_v10, %v58_v13 }
  0x1d   :  { %v64_v15 = vmul.f32 %v63_v14, %v49_v11  ;;  %v92_v33 = vsel %vm91_vm6, %v125_v25, %v90_v32 }
  0x1f   :  { %vm65_vm5 = vcmp.gt.f32.partialorder %v64_v15, 0.05 }
  0x20   :  { %v114_v16 = vsel %vm65_vm5, 1.0, %v206_v0 }
  0x21   :  { %69 = vadd.xlane.f32.xlu0 %v114_v16 }
  0x94   :  { %v70_v17 = vpop.xlane.xlu0 %69 }
  0x95   :  { %v71_v18 = vrot.slane %v70_v17, 4 }
  0x97   :  { %v72_v19 = vadd.f32 %v71_v18, %v70_v17 }
  0x99   :  { %v73_v20 = vrot.slane %v72_v19, 2 }
  0x9b   :  { %v74_v21 = vadd.f32 %v73_v20, %v72_v19 }
  0x9d   :  { %v75_v22 = vrot.slane %v74_v21, 1 }
  0x9f   :  { %v76_v23 = vadd.f32 %v75_v22, %v74_v21 }
  0xa1   :  { %115 = vpush %v76_v23 }
  0xd2   :  { %s116_s0 = spop %115 }
  0xd3   :  { %v78_v29 = vstv %s116_s0 }
  0xd4   :  { %v79_v31 = vadd.f32 %v78_v29, %v68_v28 }
  0xd6   :  { %81 = vst.msk [vmem:[#allocation2] sm:$0x1] %vm44_vm0, %v79_v31 }
  0xdd   :  { %v85_v34 = vld [vmem:[#allocation2] sm:$0x1] }
  0xde   :  { %v93_v35 = vmul.f32 %v92_v33, %v85_v34 }
  0xe0   :  { %v94_v36 = vsub.f32 1.0, %v93_v35 }
  0xe2   :  { %95 = vst.msk [vmem:[#allocation8] sm:$0x1] %vm44_vm0, %v94_v36 }
  0xe3   :  { %106 = dma.vmem_to_hbm [thread:$0]  %s102_s19, 16, %s104_s22, [#allocation5]  }
  0xe4   :  { %202 = dma.done.wait [#allocation5], 16  }
  0xe5   :  { %203 = vsyncadd [#allocation5], 4294967280 }
  0xe6   :  { %111 = vsyncpa [#allocation4], 1 }
  0xe7   :  { %112 = vsyncpa [#allocation7], 1 }
  0xe8   :  { %113 = vsyncpa [#allocation5], 1 }

</bundles_post_ra>
